<compile_context>
chip_gen: v7x
topology: tpu7x:2x2x1
jax: 0.10.0
libtpu: 0.0.40
codegen_flags: <defaults>
</compile_context>

<pallas_src>
import functools
import math

import jax
import jax.numpy as jnp
from jax.experimental import pallas as pl
from jax.experimental.pallas import tpu as pltpu


def _round_up(x, m):
    return (x + m - 1) // m * m


def _vmem_limit_bytes():
    """~96 MiB on v5e/v6e (128 MiB physical VMEM), ~48 MiB on v7x (64 MiB)."""
    cap = 64 * 1024 * 1024
    try:
        info = pltpu.get_tpu_info()
        cap = int(getattr(info, "vmem_capacity_bytes", cap) or cap)
    except Exception:
        pass
    return min(cap * 3 // 4, 100 * 1024 * 1024)


def _gate_fusion_kernel(heads_ref, w1a_ref, w1b_ref, b1_ref, lnw_ref, lnb_ref,
                        w2_ref, b2_ref, out_ref):
    num_heads = heads_ref.shape[0]

    # Streaming reduction over the head axis (running sum / running max in f32):
    # keeps ~3 live (tn, D) f32 tiles instead of materializing all H of them.
    x0 = heads_ref[0].astype(jnp.float32)

    def body(h, carry):
        s, m = carry
        x = heads_ref[h].astype(jnp.float32)
        return s + x, jnp.maximum(m, x)

    s, mx = jax.lax.fori_loop(1, num_heads, body, (x0, x0), unroll=True)
    avg = s * (1.0 / num_heads)

    # First Linear on cat([avg, mx], -1): two dots against the two halves of W1
    # (no (tn, 2D) concat temp, no zero-padded K rows). bf16 MXU operands,
    # f32 accumulation.
    h = (jnp.dot(avg.astype(jnp.bfloat16), w1a_ref[...],
                 preferred_element_type=jnp.float32)
         + jnp.dot(mx.astype(jnp.bfloat16), w1b_ref[...],
                   preferred_element_type=jnp.float32)
         + b1_ref[...])

    # Dropout(p=0.5): identity in eval mode.
    # TODO(synk): training-mode stochastic dropout not implemented.

    # LayerNorm over the real (unpadded) feature dim -- no masking needed since
    # nothing is lane-padded anymore.
    mu = jnp.mean(h, axis=-1, keepdims=True)
    diff = h - mu
    var = jnp.mean(diff * diff, axis=-1, keepdims=True)
    hn = diff * jax.lax.rsqrt(var + 1e-5) * lnw_ref[...] + lnb_ref[...]

    # Exact (erf) GELU, matching torch.nn.GELU() default semantics.
    g = 0.5 * hn * (1.0 + jax.lax.erf(hn * (1.0 / math.sqrt(2.0))))

    # Second Linear + Sigmoid -> gate (bf16 MXU operands, f32 accumulation).
    z = (jnp.dot(g.astype(jnp.bfloat16), w2_ref[...],
                 preferred_element_type=jnp.float32) + b2_ref[...])
    gate = jax.nn.sigmoid(z)

    # gate*avg + (1-gate)*mx  ==  mx + gate*(avg - mx)  (fewer VALU ops).
    out_ref[...] = (mx + gate * (avg - mx)).astype(out_ref.dtype)


def gate_fusion(heads, params, *, tile_n=None):
    """heads: (H, N, D) float32 or bfloat16 (bf16 recommended: halves the
    dominant HBM streaming traffic). params: dict from init_params."""
    H, N, D = heads.shape
    heads_itemsize = jnp.dtype(heads.dtype).itemsize
    vmem_budget = _vmem_limit_bytes()

    if tile_n is None:
        # Per-row VMEM footprint: double-buffered heads tile + double-buffered
        # output tile + ~8 live f32 activation rows (avg, mx, sum, h, hn, g, z, gate).
        row_bytes = 2 * H * D * heads_itemsize + 2 * D * heads_itemsize + 8 * D * 4
        tile_n = (vmem_budget * 6 // 10) // max(row_bytes, 1)
        tile_n = min(2048, max(16, int(tile_n)))

    # Cap tn so the grid has >= 4 steps when N allows: keeps both v7x
    # TensorCores busy and the DMA pipeline double-buffered.
    tn = min(int(tile_n), max(16, _round_up(pl.cdiv(N, 4), 16)))
    if tn >= N:
        tn = N                       # full-extent block (always a legal block dim)
    else:
        tn = _round_up(tn, 16)       # (16,128)-friendly for bf16 and f32 tiles

    grid = (pl.cdiv(N, tn),)

    # Weights/biases stay at the real D (no zero-padded lanes/rows); MXU
    # operands in bf16, biases/LN affine in f32.
    w1a = params["w1a"].astype(jnp.bfloat16)        # (D, D)  -- avg half of W1
    w1b = params["w1b"].astype(jnp.bfloat16)        # (D, D)  -- max half of W1
    w2 = params["w2"].astype(jnp.bfloat16)          # (D, D)
    b1 = params["b1"].reshape(1, D).astype(jnp.float32)
    lnw = params["ln_w"].reshape(1, D).astype(jnp.float32)
    lnb = params["ln_b"].reshape(1, D).astype(jnp.float32)
    b2 = params["b2"].reshape(1, D).astype(jnp.float32)

    const = lambda i: (0, 0)         # weights/biases VMEM-resident across the grid
    # Constant-index weights don't need double buffers; only matters for large
    # D against v7x's 64 MiB VMEM, so gate it there.
    wmode = pl.Buffered(1) if D >= 512 else None

    def wspec(shape):
        if wmode is None:
            return pl.BlockSpec(shape, const)
        return pl.BlockSpec(shape, const, pipeline_mode=wmode)

    out = pl.pallas_call(
        _gate_fusion_kernel,
        out_shape=jax.ShapeDtypeStruct((N, D), heads.dtype),
        grid_spec=pltpu.PrefetchScalarGridSpec(
            num_scalar_prefetch=0,
            grid=grid,
            in_specs=[
                pl.BlockSpec((H, tn, D), lambda i: (0, i, 0)),   # heads tile (streamed)
                wspec((D, D)),                                    # W1 avg half
                wspec((D, D)),                                    # W1 max half
                wspec((1, D)),                                    # b1
                wspec((1, D)),                                    # ln_w
                wspec((1, D)),                                    # ln_b
                wspec((D, D)),                                    # W2
                wspec((1, D)),                                    # b2
            ],
            out_specs=pl.BlockSpec((tn, D), lambda i: (i, 0)),
        ),
        compiler_params=pltpu.CompilerParams(
            dimension_semantics=("parallel",),    # megacore sharding of the N axis
            vmem_limit_bytes=int(vmem_budget),    # chip-aware scoped VMEM budget
        ),
    )(heads, w1a, w1b, b1, lnw, lnb, w2, b2)

    return out


def init_params(key, in_dim):
    """xavier_normal_ on Linear weights (math layout y = x @ W + b), zero biases,
    LayerNorm affine = (ones, zeros) -- mirrors the PyTorch module init."""
    k1, k2 = jax.random.split(key, 2)

    std1 = math.sqrt(2.0 / (2 * in_dim + in_dim))
    w1 = jax.random.normal(k1, (2 * in_dim, in_dim), jnp.float32) * std1
    w1a, w1b = w1[:in_dim, :], w1[in_dim:, :]

    std2 = math.sqrt(2.0 / (in_dim + in_dim))
    w2 = jax.random.normal(k2, (in_dim, in_dim), jnp.float32) * std2

    return {
        "w1a": w1a,
        "w1b": w1b,
        "b1": jnp.zeros((1, in_dim), jnp.float32),
        "ln_w": jnp.ones((1, in_dim), jnp.float32),
        "ln_b": jnp.zeros((1, in_dim), jnp.float32),
        "w2": w2,
        "b2": jnp.zeros((1, in_dim), jnp.float32),
    }


if __name__ == "__main__":
    H, N, D = 4, 256, 32  # heads, tokens, in_dim (small; exercises a multi-tile grid)
    key = jax.random.PRNGKey(0)
    k_heads, k_params = jax.random.split(key)

    # Stream heads as bf16: halves the dominant HBM traffic of this mem-bound kernel.
    heads = jax.random.normal(k_heads, (H, N, D), jnp.float32).astype(jnp.bfloat16)
    params = init_params(k_params, D)

    out = jax.block_until_ready(gate_fusion(heads, params))

    # Pure-JAX reference mirroring the same bf16 weight/operand quantization path.
    hf = heads.astype(jnp.float32)
    avg = jnp.mean(hf, axis=0)
    mx = jnp.max(hf, axis=0)
    h = (jnp.dot(avg.astype(jnp.bfloat16), params["w1a"].astype(jnp.bfloat16),
                 preferred_element_type=jnp.float32)
         + jnp.dot(mx.astype(jnp.bfloat16), params["w1b"].astype(jnp.bfloat16),
                   preferred_element_type=jnp.float32)
         + params["b1"])
    mu = jnp.mean(h, axis=-1, keepdims=True)
    var = jnp.mean((h - mu) ** 2, axis=-1, keepdims=True)
    hn = (h - mu) * jax.lax.rsqrt(var + 1e-5) * params["ln_w"] + params["ln_b"]
    g = 0.5 * hn * (1.0 + jax.lax.erf(hn / math.sqrt(2.0)))
    z = (jnp.dot(g.astype(jnp.bfloat16), params["w2"].astype(jnp.bfloat16),
                 preferred_element_type=jnp.float32) + params["b2"])
    gate = jax.nn.sigmoid(z)
    ref = gate * avg + (1.0 - gate) * mx

    assert out.shape == (N, D)
    out_f = out.astype(jnp.float32)
    max_err = float(jnp.max(jnp.abs(out_f - ref)))
    assert jnp.allclose(out_f, ref, atol=3e-2, rtol=3e-2), \
        f"mismatch vs reference (max abs err {max_err})"
    print("KERNEL_OK")
</pallas_src>

<mosaic_0001>
module attributes {stable_mosaic.version = 11 : i64} {
  func.func @_gate_fusion_kernel(%arg0: i32, %arg1: memref<4x64x32xbf16, #tpu.memory_space<vmem>>, %arg2: memref<32x32xbf16, #tpu.memory_space<vmem>>, %arg3: memref<32x32xbf16, #tpu.memory_space<vmem>>, %arg4: memref<1x32xf32, #tpu.memory_space<vmem>>, %arg5: memref<1x32xf32, #tpu.memory_space<vmem>>, %arg6: memref<1x32xf32, #tpu.memory_space<vmem>>, %arg7: memref<32x32xbf16, #tpu.memory_space<vmem>>, %arg8: memref<1x32xf32, #tpu.memory_space<vmem>>, %arg9: memref<64x32xbf16, #tpu.memory_space<vmem>>) attributes {dimension_semantics = [#tpu.dimension_semantics<parallel>], iteration_bounds = array<i64: 4>, scalar_prefetch = 0 : i64, scratch_operands = 0 : i64, tpu.core_type = #tpu.core_type<tc>, window_params = [{transform_indices = @transform_0, window_bounds = array<i64: 4, 64, 32>}, {pipeline_mode = #tpu.pipeline_mode<synchronous>, transform_indices = @transform_1, window_bounds = array<i64: 32, 32>}, {pipeline_mode = #tpu.pipeline_mode<synchronous>, transform_indices = @transform_2, window_bounds = array<i64: 32, 32>}, {pipeline_mode = #tpu.pipeline_mode<synchronous>, transform_indices = @transform_3, window_bounds = array<i64: 1, 32>}, {pipeline_mode = #tpu.pipeline_mode<synchronous>, transform_indices = @transform_4, window_bounds = array<i64: 1, 32>}, {pipeline_mode = #tpu.pipeline_mode<synchronous>, transform_indices = @transform_5, window_bounds = array<i64: 1, 32>}, {pipeline_mode = #tpu.pipeline_mode<synchronous>, transform_indices = @transform_6, window_bounds = array<i64: 32, 32>}, {pipeline_mode = #tpu.pipeline_mode<synchronous>, transform_indices = @transform_7, window_bounds = array<i64: 1, 32>}, {transform_indices = @transform_8, window_bounds = array<i64: 64, 32>}]} {
    %c0 = arith.constant 0 : index
    %c0_0 = arith.constant 0 : index
    %c0_1 = arith.constant 0 : index
    %0 = vector.load %arg1[%c0, %c0_0, %c0_1] : memref<4x64x32xbf16, #tpu.memory_space<vmem>>, vector<1x64x32xbf16>
    %1 = vector.shape_cast %0 : vector<1x64x32xbf16> to vector<64x32xbf16>
    %2 = arith.extf %1 : vector<64x32xbf16> to vector<64x32xf32>
    %c1_i32 = arith.constant 1 : i32
    %3 = arith.index_cast %c1_i32 : i32 to index
    %c0_2 = arith.constant 0 : index
    %c0_3 = arith.constant 0 : index
    %4 = vector.load %arg1[%3, %c0_2, %c0_3] : memref<4x64x32xbf16, #tpu.memory_space<vmem>>, vector<1x64x32xbf16>
    %5 = vector.shape_cast %4 : vector<1x64x32xbf16> to vector<64x32xbf16>
    %6 = arith.extf %5 : vector<64x32xbf16> to vector<64x32xf32>
    %7 = arith.addf %2, %6 : vector<64x32xf32>
    %8 = arith.maximumf %2, %6 : vector<64x32xf32>
    %c2_i32 = arith.constant 2 : i32
    %9 = arith.index_cast %c2_i32 : i32 to index
    %c0_4 = arith.constant 0 : index
    %c0_5 = arith.constant 0 : index
    %10 = vector.load %arg1[%9, %c0_4, %c0_5] : memref<4x64x32xbf16, #tpu.memory_space<vmem>>, vector<1x64x32xbf16>
    %11 = vector.shape_cast %10 : vector<1x64x32xbf16> to vector<64x32xbf16>
    %12 = arith.extf %11 : vector<64x32xbf16> to vector<64x32xf32>
    %13 = arith.addf %7, %12 : vector<64x32xf32>
    %14 = arith.maximumf %8, %12 : vector<64x32xf32>
    %c3_i32 = arith.constant 3 : i32
    %15 = arith.index_cast %c3_i32 : i32 to index
    %c0_6 = arith.constant 0 : index
    %c0_7 = arith.constant 0 : index
    %16 = vector.load %arg1[%15, %c0_6, %c0_7] : memref<4x64x32xbf16, #tpu.memory_space<vmem>>, vector<1x64x32xbf16>
    %17 = vector.shape_cast %16 : vector<1x64x32xbf16> to vector<64x32xbf16>
    %18 = arith.extf %17 : vector<64x32xbf16> to vector<64x32xf32>
    %19 = arith.addf %13, %18 : vector<64x32xf32>
    %20 = arith.maximumf %14, %18 : vector<64x32xf32>
    %c3_i32_8 = arith.constant 3 : i32
    %cst = arith.constant 2.500000e-01 : f32
    %21 = vector.broadcast %cst : f32 to vector<64x32xf32>
    %22 = arith.mulf %19, %21 : vector<64x32xf32>
    %23 = arith.truncf %22 : vector<64x32xf32> to vector<64x32xbf16>
    %c0_9 = arith.constant 0 : index
    %c0_10 = arith.constant 0 : index
    %24 = vector.load %arg2[%c0_9, %c0_10] : memref<32x32xbf16, #tpu.memory_space<vmem>>, vector<32x32xbf16>
    %cst_11 = arith.constant dense<0.000000e+00> : vector<64x32xf32>
    %25 = tpu.matmul %23, %24, %cst_11 {dimension_numbers = #tpu.dot_dimension_numbers<[1], [0], [0], [1], [0, 0, 1, 1], [], []>} : vector<64x32xbf16>, vector<32x32xbf16>, vector<64x32xf32> -> vector<64x32xf32>
    %26 = arith.truncf %20 : vector<64x32xf32> to vector<64x32xbf16>
    %c0_12 = arith.constant 0 : index
    %c0_13 = arith.constant 0 : index
    %27 = vector.load %arg3[%c0_12, %c0_13] : memref<32x32xbf16, #tpu.memory_space<vmem>>, vector<32x32xbf16>
    %cst_14 = arith.constant dense<0.000000e+00> : vector<64x32xf32>
    %28 = tpu.matmul %26, %27, %cst_14 {dimension_numbers = #tpu.dot_dimension_numbers<[1], [0], [0], [1], [0, 0, 1, 1], [], []>} : vector<64x32xbf16>, vector<32x32xbf16>, vector<64x32xf32> -> vector<64x32xf32>
    %29 = arith.addf %25, %28 : vector<64x32xf32>
    %c0_15 = arith.constant 0 : index
    %c0_16 = arith.constant 0 : index
    %30 = vector.load %arg4[%c0_15, %c0_16] : memref<1x32xf32, #tpu.memory_space<vmem>>, vector<1x32xf32>
    %31 = vector.broadcast %30 : vector<1x32xf32> to vector<64x32xf32>
    %32 = arith.addf %29, %31 : vector<64x32xf32>
    %cst_17 = arith.constant dense<0.000000e+00> : vector<64xf32>
    %33 = vector.multi_reduction <add>, %32, %cst_17 [1] : vector<64x32xf32> to vector<64xf32>
    %34 = vector.shape_cast %33 : vector<64xf32> to vector<64x1xf32>
    %cst_18 = arith.constant 3.200000e+01 : f32
    %35 = vector.broadcast %cst_18 : f32 to vector<64x1xf32>
    %36 = arith.divf %34, %35 : vector<64x1xf32>
    %37 = vector.broadcast %36 : vector<64x1xf32> to vector<64x32xf32>
    %38 = arith.subf %32, %37 : vector<64x32xf32>
    %39 = arith.mulf %38, %38 : vector<64x32xf32>
    %cst_19 = arith.constant dense<0.000000e+00> : vector<64xf32>
    %40 = vector.multi_reduction <add>, %39, %cst_19 [1] : vector<64x32xf32> to vector<64xf32>
    %41 = vector.shape_cast %40 : vector<64xf32> to vector<64x1xf32>
    %cst_20 = arith.constant 3.200000e+01 : f32
    %42 = vector.broadcast %cst_20 : f32 to vector<64x1xf32>
    %43 = arith.divf %41, %42 : vector<64x1xf32>
    %cst_21 = arith.constant 9.99999974E-6 : f32
    %44 = vector.broadcast %cst_21 : f32 to vector<64x1xf32>
    %45 = arith.addf %43, %44 : vector<64x1xf32>
    %46 = math.rsqrt %45 : vector<64x1xf32>
    %47 = vector.broadcast %46 : vector<64x1xf32> to vector<64x32xf32>
    %48 = arith.mulf %38, %47 : vector<64x32xf32>
    %c0_22 = arith.constant 0 : index
    %c0_23 = arith.constant 0 : index
    %49 = vector.load %arg5[%c0_22, %c0_23] : memref<1x32xf32, #tpu.memory_space<vmem>>, vector<1x32xf32>
    %50 = vector.broadcast %49 : vector<1x32xf32> to vector<64x32xf32>
    %51 = arith.mulf %48, %50 : vector<64x32xf32>
    %c0_24 = arith.constant 0 : index
    %c0_25 = arith.constant 0 : index
    %52 = vector.load %arg6[%c0_24, %c0_25] : memref<1x32xf32, #tpu.memory_space<vmem>>, vector<1x32xf32>
    %53 = vector.broadcast %52 : vector<1x32xf32> to vector<64x32xf32>
    %54 = arith.addf %51, %53 : vector<64x32xf32>
    %cst_26 = arith.constant 5.000000e-01 : f32
    %55 = vector.broadcast %cst_26 : f32 to vector<64x32xf32>
    %56 = arith.mulf %55, %54 : vector<64x32xf32>
    %cst_27 = arith.constant 0.707106769 : f32
    %57 = vector.broadcast %cst_27 : f32 to vector<64x32xf32>
    %58 = arith.mulf %54, %57 : vector<64x32xf32>
    %59 = math.erf %58 : vector<64x32xf32>
    %cst_28 = arith.constant 1.000000e+00 : f32
    %60 = vector.broadcast %cst_28 : f32 to vector<64x32xf32>
    %61 = arith.addf %60, %59 : vector<64x32xf32>
    %62 = arith.mulf %56, %61 : vector<64x32xf32>
    %63 = arith.truncf %62 : vector<64x32xf32> to vector<64x32xbf16>
    %c0_29 = arith.constant 0 : index
    %c0_30 = arith.constant 0 : index
    %64 = vector.load %arg7[%c0_29, %c0_30] : memref<32x32xbf16, #tpu.memory_space<vmem>>, vector<32x32xbf16>
    %cst_31 = arith.constant dense<0.000000e+00> : vector<64x32xf32>
    %65 = tpu.matmul %63, %64, %cst_31 {dimension_numbers = #tpu.dot_dimension_numbers<[1], [0], [0], [1], [0, 0, 1, 1], [], []>} : vector<64x32xbf16>, vector<32x32xbf16>, vector<64x32xf32> -> vector<64x32xf32>
    %c0_32 = arith.constant 0 : index
    %c0_33 = arith.constant 0 : index
    %66 = vector.load %arg8[%c0_32, %c0_33] : memref<1x32xf32, #tpu.memory_space<vmem>>, vector<1x32xf32>
    %67 = vector.broadcast %66 : vector<1x32xf32> to vector<64x32xf32>
    %68 = arith.addf %65, %67 : vector<64x32xf32>
    %69 = arith.negf %68 : vector<64x32xf32>
    %70 = math.exp %69 : vector<64x32xf32>
    %cst_34 = arith.constant 1.000000e+00 : f32
    %71 = vector.broadcast %cst_34 : f32 to vector<64x32xf32>
    %72 = arith.addf %71, %70 : vector<64x32xf32>
    %73 = arith.divf %71, %72 : vector<64x32xf32>
    %74 = arith.subf %22, %20 : vector<64x32xf32>
    %75 = arith.mulf %73, %74 : vector<64x32xf32>
    %76 = arith.addf %20, %75 : vector<64x32xf32>
    %77 = arith.truncf %76 : vector<64x32xf32> to vector<64x32xbf16>
    %c0_35 = arith.constant 0 : index
    %c0_36 = arith.constant 0 : index
    %78 = vector.load %arg9[%c0_35, %c0_36] : memref<64x32xbf16, #tpu.memory_space<vmem>>, vector<64x32xbf16>
    tpu.vector_store %arg9[%c0_35, %c0_36], %77 {strides = array<i32>} : memref<64x32xbf16, #tpu.memory_space<vmem>>, vector<64x32xbf16>,
    return
  }
  func.func @transform_0(%arg0: i32) -> (i32, i32, i32) {
    %c0_i32 = arith.constant 0 : i32
    %c0_i32_0 = arith.constant 0 : i32
    %c0_i32_1 = arith.constant 0 : i32
    return %c0_i32, %arg0, %c0_i32_0 : i32, i32, i32
  }
  func.func @transform_1(%arg0: i32) -> (i32, i32) {
    %c0_i32 = arith.constant 0 : i32
    %c0_i32_0 = arith.constant 0 : i32
    %c0_i32_1 = arith.constant 0 : i32
    return %c0_i32, %c0_i32_0 : i32, i32
  }
  func.func @transform_2(%arg0: i32) -> (i32, i32) {
    %c0_i32 = arith.constant 0 : i32
    %c0_i32_0 = arith.constant 0 : i32
    %c0_i32_1 = arith.constant 0 : i32
    return %c0_i32, %c0_i32_0 : i32, i32
  }
  func.func @transform_3(%arg0: i32) -> (i32, i32) {
    %c0_i32 = arith.constant 0 : i32
    %c0_i32_0 = arith.constant 0 : i32
    %c0_i32_1 = arith.constant 0 : i32
    return %c0_i32, %c0_i32_0 : i32, i32
  }
  func.func @transform_4(%arg0: i32) -> (i32, i32) {
    %c0_i32 = arith.constant 0 : i32
    %c0_i32_0 = arith.constant 0 : i32
    %c0_i32_1 = arith.constant 0 : i32
    return %c0_i32, %c0_i32_0 : i32, i32
  }
  func.func @transform_5(%arg0: i32) -> (i32, i32) {
    %c0_i32 = arith.constant 0 : i32
    %c0_i32_0 = arith.constant 0 : i32
    %c0_i32_1 = arith.constant 0 : i32
    return %c0_i32, %c0_i32_0 : i32, i32
  }
  func.func @transform_6(%arg0: i32) -> (i32, i32) {
    %c0_i32 = arith.constant 0 : i32
    %c0_i32_0 = arith.constant 0 : i32
    %c0_i32_1 = arith.constant 0 : i32
    return %c0_i32, %c0_i32_0 : i32, i32
  }
  func.func @transform_7(%arg0: i32) -> (i32, i32) {
    %c0_i32 = arith.constant 0 : i32
    %c0_i32_0 = arith.constant 0 : i32
    %c0_i32_1 = arith.constant 0 : i32
    return %c0_i32, %c0_i32_0 : i32, i32
  }
  func.func @transform_8(%arg0: i32) -> (i32, i32) {
    %c0_i32 = arith.constant 0 : i32
    %c0_i32_0 = arith.constant 0 : i32
    return %arg0, %c0_i32 : i32, i32
  }
}

</mosaic_0001>

<bundles_post_ra>
// kernel: tpu_custom_call.1
= control target key start
LH: loop header
LB: loop body
LE: loop exit
PB: predicated region body
PF: predicated region fallthrough
CT: control target
= control target key end

     0   :  { %s1654_s27 = smov 0   ;;  %s1656_s28 = smov 0   ;;  %s1938_s0 = inlined_call_operand.vmem [shape: bf16[4,256,32], index: 0, kind: input, shape index: {}]   ;;  %s1939_s1 = inlined_call_operand.vmem [shape: bf16[32,32], index: 1, kind: input, shape index: {}]   ;;  %s1940_s2 = inlined_call_operand.vmem [shape: bf16[32,32], index: 2, kind: input, shape index: {}]   ;;  %s1941_s3 = inlined_call_operand.vmem [shape: f32[1,32], index: 3, kind: input, shape index: {}]   ;;  %s1942_s4 = inlined_call_operand.vmem [shape: f32[1,32], index: 4, kind: input, shape index: {}]   ;;  %s1943_s5 = inlined_call_operand.vmem [shape: f32[1,32], index: 5, kind: input, shape index: {}]   ;;  %s1944_s6 = inlined_call_operand.vmem [shape: bf16[32,32], index: 6, kind: input, shape index: {}]   ;;  %s1945_s7 = inlined_call_operand.vmem [shape: f32[1,32], index: 7, kind: input, shape index: {}]   ;;  %s1946_s8 = inlined_call_operand.vmem [shape: bf16[256,32], index: 8, kind: output, shape index: {}]  }
   0x1   :  { %s1658_s29 = smov 0  }
   0x2 LB: > { %s1262_s30 = sadd.s32 4294967295, %s1607_s29   ;;  %s1671_s9 = sadd.s32 1, %s1607_s29   ;;  %s1607_s29 = sphi %s1658_s29, %s1949_s29   ;;  %s1603_s28 = sphi %s1656_s28, %s1948_s28   ;;  %s1599_s27 = sphi %s1654_s27, %s1947_s27  }
   0x3   : > { %s22_s10 = ssub.s32 %s1607_s29, %s1671_s9  ;;  %s25_s11 = sadd.s32 1, %s1603_s28 }
   0x4   : > { %p23_p0 = scmp.eq.s32.totalorder %s22_s10, 0  ;;  %p32_p1 = scmp.ne.s32.totalorder %s1603_s28, %s1599_s27 }
   0x5   : > { %p33_p2 = scmp.eq.s32.totalorder %s1607_s29, 0  ;;  %p1265_p4 = scmp.ge.s32.totalorder %s1607_s29, 4 }
   0x6   : > { %s1680_s12 = scalar_select %p23_p0, %s1603_s28, %s25_s11  }
   0x7   : > { %p34_p3 = por %p33_p2, %p32_p1  ;;  %252 = sbr.rel (%p1265_p4) target bundleno = 26 (0x1a), region = 44 }
   0xe   : > { %255 = sbr.rel (!%p34_p3) target bundleno = 26 (0x1a), region = 48  ;;  %s257_s13 = sand.u32 (%p34_p3), 1, %s1603_s28  }
   0xf   : > { %s1337_s14 = sshll.u32 (%p34_p3), %s1607_s29, 5  ;;  %s1266_s15 = sshll.u32 (%p34_p3), %s257_s13, 7 }
  0x10   : > { %s1688_s18 = scalar_lea.vmem (%p34_p3), %s1938_s0, %s1337_s14  ;;  %s259_s19 = scalar_lea.vmem (%p34_p3), [#allocation2], %s1266_s15 }
  0x11   : > { %v278_v0 = vld [vmem:[%s1688_s18] sm:$0xff] (%p34_p3)   ;;  %v282_v1 = vld [vmem:[%s1688_s18 + $0x8] sm:$0xff] (%p34_p3)   ;;  %v286_v2 = vld [vmem:[%s1688_s18 + $0x10] sm:$0xff] (%p34_p3)  }
  0x12   : > { %279 = vst [vmem:[%s259_s19] sm:$0xff] (%p34_p3), %v278_v0   ;;  %283 = vst [vmem:[%s259_s19 + $0x8] sm:$0xff] (%p34_p3), %v282_v1   ;;  %v290_v3 = vld [vmem:[%s1688_s18 + $0x18] sm:$0xff] (%p34_p3)   ;;  %v294_v4 = vld [vmem:[%s1688_s18 + $0x80] sm:$0xff] (%p34_p3)  }
  0x13   : > { %287 = vst [vmem:[%s259_s19 + $0x10] sm:$0xff] (%p34_p3), %v286_v2   ;;  %v298_v5 = vld [vmem:[%s1688_s18 + $0x88] sm:$0xff] (%p34_p3)   ;;  %291 = vst [vmem:[%s259_s19 + $0x18] sm:$0xff] (%p34_p3), %v290_v3   ;;  %v302_v6 = vld [vmem:[%s1688_s18 + $0x90] sm:$0xff] (%p34_p3)  }
  0x14   : > { %295 = vst [vmem:[%s259_s19 + $0x20] sm:$0xff] (%p34_p3), %v294_v4   ;;  %299 = vst [vmem:[%s259_s19 + $0x28] sm:$0xff] (%p34_p3), %v298_v5   ;;  %v306_v7 = vld [vmem:[%s1688_s18 + $0x98] sm:$0xff] (%p34_p3)   ;;  %v310_v8 = vld [vmem:[%s1688_s18 + $0x100] sm:$0xff] (%p34_p3)  }
  0x15   : > { %303 = vst [vmem:[%s259_s19 + $0x30] sm:$0xff] %v302_v6   ;;  %307 = vst [vmem:[%s259_s19 + $0x38] sm:$0xff] %v306_v7   ;;  %v314_v9 = vld [vmem:[%s1688_s18 + $0x108] sm:$0xff]   ;;  %v318_v10 = vld [vmem:[%s1688_s18 + $0x110] sm:$0xff]  }
  0x16   : > { %311 = vst [vmem:[%s259_s19 + $0x40] sm:$0xff] %v310_v8   ;;  %v322_v11 = vld [vmem:[%s1688_s18 + $0x118] sm:$0xff]   ;;  %315 = vst [vmem:[%s259_s19 + $0x48] sm:$0xff] %v314_v9   ;;  %v326_v12 = vld [vmem:[%s1688_s18 + $0x180] sm:$0xff]  }
  0x17   : > { %319 = vst [vmem:[%s259_s19 + $0x50] sm:$0xff] %v318_v10   ;;  %323 = vst [vmem:[%s259_s19 + $0x58] sm:$0xff] %v322_v11   ;;  %v330_v13 = vld [vmem:[%s1688_s18 + $0x188] sm:$0xff]   ;;  %v334_v14 = vld [vmem:[%s1688_s18 + $0x190] sm:$0xff]  }
  0x18   : > { %327 = vst [vmem:[%s259_s19 + $0x60] sm:$0xff] %v326_v12   ;;  %331 = vst [vmem:[%s259_s19 + $0x68] sm:$0xff] %v330_v13   ;;  %v338_v15 = vld [vmem:[%s1688_s18 + $0x198] sm:$0xff]  }
  0x19   : > { %335 = vst [vmem:[%s259_s19 + $0x70] sm:$0xff] %v334_v14   ;;  %339 = vst [vmem:[%s259_s19 + $0x78] sm:$0xff] %v338_v15  }
  0x1a PF: > { %p1269_p5 = scmp.ge.s32.totalorder %s1607_s29, 1  ;;  %p427_p6 = scmp.lt.s32.totalorder %s1607_s29, 5 }
  0x1c   : > { %p428_p7 = pnand %p1269_p5, %p427_p6 }
  0x1d   : > { %v1515_v16 = vld [vmem:[%s1940_s2] sm:$0xff] (!%p428_p7)   ;;  %s434_s22 = sand.u32 (!%p428_p7), 1, %s1599_s27   ;;  %v1516_v17 = vld [vmem:[%s1940_s2 + $0x8] sm:$0xff] (!%p428_p7)   ;;  %vm626_vm0 = vcmask (!%p428_p7), 261120   ;;  %vm1191_vm1 = vcmask (!%p428_p7), 257024  }
  0x1e   : > { %431 = sbr.rel (%p428_p7) target bundleno = 871 (0x367), region = 89  ;;  %s1270_s25 = sshll.u32 (!%p428_p7), %s434_s22, 7  ;;  %1443 = vmatprep.subr.bf16.mxu0 (!%p428_p7), %v1515_v16  ;;  %1479 = vmatprep.subr.bf16.mxu1 (!%p428_p7), %v1515_v16  ;;  %v1724_v26 = vld [vmem:[%s1939_s1] sm:$0xff] (!%p428_p7)   ;;  %v1518_v11 = vld [vmem:[%s1939_s1 + $0x8] sm:$0xff] (!%p428_p7)  }
  0x1f   : > { %1444 = vmatpush3.bf16.msra.mxu0 (!%p428_p7), %v1515_v16  ;;  %s1715_s26 = scalar_lea.vmem (!%p428_p7), [#allocation2], %s1270_s25  ;;  %1481 = vmatpush3.bf16.msra.mxu1 (!%p428_p7), %v1515_v16 }
  0x20   : > { %v1347_v18 = vld [vmem:[%s1715_s26] sm:$0xff] (!%p428_p7)   ;;  %1445 = vmatprep.subr.bf16.mxu0 (!%p428_p7), %v1516_v17  ;;  %v1410_v27 = vld [vmem:[%s1715_s26 + $0x8] sm:$0xff] (!%p428_p7)   ;;  %1480 = vmatprep.subr.bf16.mxu1 (!%p428_p7), %v1516_v17  ;;  %v1732_v51 = vld [vmem:[%s1715_s26 + $0x10] sm:$0xff] (!%p428_p7)  }
  0x21   : > { %v1413_v19 = vld [vmem:[%s1715_s26 + $0x20] sm:$0xff] (!%p428_p7)   ;;  %v1348_v21 = vunpack.c.l.bf16 (!%p428_p7), %v1347_v18  ;;  %v1349_v22 = vunpack.c.h.bf16 (!%p428_p7), %v1347_v18  ;;  %v1414_v32 = vld [vmem:[%s1715_s26 + $0x28] sm:$0xff] (!%p428_p7)   ;;  %v1352_v37 = vunpack.c.l.bf16 (!%p428_p7), %v1410_v27  ;;  %v1353_v38 = vunpack.c.h.bf16 (!%p428_p7), %v1410_v27  ;;  %v1415_v60 = vld [vmem:[%s1715_s26 + $0x30] sm:$0xff] (!%p428_p7)  }
  0x22   : > { %v1417_v20 = vld [vmem:[%s1715_s26 + $0x40] sm:$0xff] (!%p428_p7)   ;;  %v1364_v23 = vunpack.c.l.bf16 (!%p428_p7), %v1413_v19  ;;  %v1365_v24 = vunpack.c.h.bf16 (!%p428_p7), %v1413_v19  ;;  %v1418_v33 = vld [vmem:[%s1715_s26 + $0x48] sm:$0xff] (!%p428_p7)   ;;  %v1368_v39 = vunpack.c.l.bf16 (!%p428_p7), %v1414_v32  ;;  %v1369_v40 = vunpack.c.h.bf16 (!%p428_p7), %v1414_v32  ;;  %v1419_v5 = vld [vmem:[%s1715_s26 + $0x50] sm:$0xff] (!%p428_p7)  }
  0x23   : > { %v1421_v25 = vld [vmem:[%s1715_s26 + $0x60] sm:$0xff] (!%p428_p7)   ;;  %v1380_v28 = vunpack.c.l.bf16 (!%p428_p7), %v1417_v20  ;;  %v1381_v29 = vunpack.c.h.bf16 (!%p428_p7), %v1417_v20  ;;  %v1422_v34 = vld [vmem:[%s1715_s26 + $0x68] sm:$0xff] (!%p428_p7)   ;;  %1446 = vmatpush3.bf16.msra.mxu0 (!%p428_p7), %v1516_v17  ;;  %v1384_v41 = vunpack.c.l.bf16 (!%p428_p7), %v1418_v33  ;;  %v1385_v42 = vunpack.c.h.bf16 (!%p428_p7), %v1418_v33  ;;  %1482 = vmatpush3.bf16.msra.mxu1 (!%p428_p7), %v1516_v17  ;;  %v1423_v17 = vld [vmem:[%s1715_s26 + $0x70] sm:$0xff] (!%p428_p7)  }
  0x24   : > { %v1396_v30 = vunpack.c.l.bf16 (!%p428_p7), %v1421_v25  ;;  %v1397_v31 = vunpack.c.h.bf16 (!%p428_p7), %v1421_v25  ;;  %v516_v35 = vmax.f32 (!%p428_p7), %v1348_v21, %v1364_v23  ;;  %v517_v36 = vmax.f32 (!%p428_p7), %v1349_v22, %v1365_v24  ;;  %1455 = vmatprep.subr.bf16.mxu0 (!%p428_p7), %v1724_v26  ;;  %v1412_v18 = vld [vmem:[%s1715_s26 + $0x18] sm:$0xff] (!%p428_p7)  }
  0x25   : > { %v1400_v45 = vunpack.c.l.bf16 %v1422_v34  ;;  %v1401_v46 = vunpack.c.h.bf16 %v1422_v34  ;;  %v518_v47 = vmax.f32 %v1352_v37, %v1368_v39  ;;  %v519_v48 = vmax.f32 %v1353_v38, %v1369_v40  ;;  %v1420_v25 = vld [vmem:[%s1715_s26 + $0x58] sm:$0xff]  }
  0x26   : > { %v549_v43 = vmax.f32 %v516_v35, %v1380_v28  ;;  %v550_v44 = vmax.f32 %v517_v36, %v1381_v29  ;;  %v508_v49 = vadd.f32 %v1364_v23, %v1348_v21  ;;  %v509_v50 = vadd.f32 %v1365_v24, %v1349_v22  ;;  %v1416_v21 = vld [vmem:[%s1715_s26 + $0x38] sm:$0xff]  }
  0x27   : > { %v510_v54 = vadd.f32 %v1368_v39, %v1352_v37  ;;  %v511_v55 = vadd.f32 %v1369_v40, %v1353_v38  ;;  %v551_v56 = vmax.f32 %v518_v47, %v1384_v41  ;;  %v552_v57 = vmax.f32 %v519_v48, %v1385_v42  ;;  %v1424_v27 = vld [vmem:[%s1715_s26 + $0x78] sm:$0xff]   ;;  %s1271_s26 = sshll.u32 %s1262_s30, 3 }
  0x28   : > { %v1734_v52 = vmax.f32 %v549_v43, %v1396_v30  ;;  %v1736_v53 = vmax.f32 %v550_v44, %v1397_v31  ;;  %v541_v58 = vadd.f32 %v1380_v28, %v508_v49  ;;  %v542_v59 = vadd.f32 %v1381_v29, %v509_v50  ;;  %p469_p8 = scmp.lt.s32.totalorder %s1271_s26, 31 }
  0x29   : > { %v543_v62 = vadd.f32 %v1384_v41, %v510_v54  ;;  %v544_v63 = vadd.f32 %v1385_v42, %v511_v55  ;;  %v1356_v0 = vunpack.c.l.bf16 %v1732_v51  ;;  %v1742_v1 = vmax.f32 %v551_v56, %v1400_v45 }
  0x2a   : > { %v606_v61 = vpack.c.bf16 %v1736_v53, %v1734_v52  ;;  %v1744_v2 = vmax.f32 %v552_v57, %v1401_v46  ;;  %v574_v3 = vadd.f32 %v1396_v30, %v541_v58  ;;  %v575_v4 = vadd.f32 %v1397_v31, %v542_v59  ;;  %s1951_s26 = smov (!%p469_p8, %s1271_s26), 31 }
  0x2b   : > { %v576_v6 = vadd.f32 %v1400_v45, %v543_v62  ;;  %v577_v7 = vadd.f32 %v1401_v46, %v544_v63  ;;  %v1357_v8 = vunpack.c.h.bf16 %v1732_v51  ;;  %v1372_v9 = vunpack.c.l.bf16 %v1415_v60  ;;  %s1272_s29 = sshll.u32 %s1951_s26, 2 }
  0x2c   : > { %1447 = vmatprep.mubr.msk.bf16.mxu0 %vm626_vm0, %v606_v61  ;;  %v607_v10 = vpack.c.bf16 %v1744_v2, %v1742_v1  ;;  %v1754_v12 = vmul.f32 0.25, %v574_v3  ;;  %v1756_v13 = vmul.f32 0.25, %v575_v4  ;;  %v1373_v14 = vunpack.c.h.bf16 %v1415_v60  ;;  %s1895_s10 = scalar_lea.vmem %s1946_s8, %s1272_s29 }
  0x2d   : > { %v520_v15 = vmax.f32 %v1356_v0, %v1372_v9  ;;  %v1388_v16 = vunpack.c.l.bf16 %v1419_v5  ;;  %v1765_v22 = vmul.f32 0.25, %v576_v6  ;;  %v1767_v23 = vmul.f32 0.25, %v577_v7 }
  0x2e   : > { %1448 = vmatmul.mubr.msk.bf16.vlgmr.msra.gmra.mrb[0].mxu0 %vm626_vm0, %v607_v10  ;;  %v598_v19 = vpack.c.bf16 %v1756_v13, %v1754_v12  ;;  %v521_v20 = vmax.f32 %v1357_v8, %v1373_v14  ;;  %v1389_v24 = vunpack.c.h.bf16 %v1419_v5  ;;  %v1404_v29 = vunpack.c.l.bf16 %v1423_v17 }
  0x2f   : > { %1456 = vmatpush3.bf16.msra.mxu0 %v1724_v26  ;;  %v553_v28 = vmax.f32 %v520_v15, %v1388_v16  ;;  %v1405_v30 = vunpack.c.h.bf16 %v1423_v17  ;;  %v1360_v31 = vunpack.c.l.bf16 %v1412_v18  ;;  %v1361_v33 = vunpack.c.h.bf16 %v1412_v18 }
  0x30   : > { %1457 = vmatprep.subr.bf16.mxu0 %v1518_v11  ;;  %1459 = vmatprep.mubr.msk.bf16.mxu0 %vm626_vm0, %v598_v19  ;;  %v554_v32 = vmax.f32 %v521_v20, %v1389_v24  ;;  %v1376_v34 = vunpack.c.l.bf16 %v1416_v21  ;;  %v1377_v35 = vunpack.c.h.bf16 %v1416_v21  ;;  %v1392_v26 = vunpack.c.l.bf16 %v1420_v25 }
  0x31   : > { %v1772_v36 = vmax.f32 %v553_v28, %v1404_v29  ;;  %v1393_v37 = vunpack.c.h.bf16 %v1420_v25  ;;  %v1408_v38 = vunpack.c.l.bf16 %v1424_v27  ;;  %v1409_v42 = vunpack.c.h.bf16 %v1424_v27 }
  0x32   : > { %v1774_v39 = vmax.f32 %v554_v32, %v1405_v30  ;;  %v522_v40 = vmax.f32 %v1360_v31, %v1376_v34  ;;  %v523_v41 = vmax.f32 %v1361_v33, %v1377_v35  ;;  %v512_v43 = vadd.f32 %v1372_v9, %v1356_v0 }
  0x33   : > { %1458 = vmatpush3.bf16.msra.mxu0 %v1518_v11  ;;  %v513_v44 = vadd.f32 %v1373_v14, %v1357_v8  ;;  %v514_v45 = vadd.f32 %v1376_v34, %v1360_v31  ;;  %v515_v46 = vadd.f32 %v1377_v35, %v1361_v33  ;;  %v599_v47 = vpack.c.bf16 %v1767_v23, %v1765_v22  ;;  %v1309_v8 = vld [vmem:[%s1941_s3] ss:$0 sm:$0xff] }
  0x34   : > { %v608_v48 = vpack.c.bf16 %v1774_v39, %v1772_v36  ;;  %v555_v49 = vmax.f32 %v522_v40, %v1392_v26  ;;  %v556_v50 = vmax.f32 %v523_v41, %v1393_v37  ;;  %v545_v51 = vadd.f32 %v1388_v16, %v512_v43 }
  0x35   : > { %v546_v54 = vadd.f32 %v1389_v24, %v513_v44  ;;  %v547_v55 = vadd.f32 %v1392_v26, %v514_v45  ;;  %v548_v56 = vadd.f32 %v1393_v37, %v515_v46 }
  0x36   : > { %1451 = vmatprep.mubr.msk.bf16.mxu1 %vm626_vm0, %v608_v48  ;;  %v1781_v57 = vmax.f32 %v555_v49, %v1408_v38  ;;  %v1783_v58 = vmax.f32 %v556_v50, %v1409_v42  ;;  %v578_v59 = vadd.f32 %v1404_v29, %v545_v51 }
  0x37   : > { %v579_v60 = vadd.f32 %v1405_v30, %v546_v54  ;;  %v580_v61 = vadd.f32 %v1408_v38, %v547_v55  ;;  %v581_v62 = vadd.f32 %v1409_v42, %v548_v56 }
  0x38   : > { %v609_v63 = vpack.c.bf16 %v1783_v58, %v1781_v57  ;;  %v1788_v0 = vmul.f32 0.25, %v578_v59 }
  0x39   : > { %v1790_v3 = vmul.f32 0.25, %v579_v60  ;;  %v1792_v4 = vmul.f32 0.25, %v580_v61  ;;  %v1794_v5 = vmul.f32 0.25, %v581_v62 }
  0x3a   : > { %1460 = vmatmul.mubr.msk.bf16.vlgmr.msra.gmra.mrb[0].mxu0 %vm626_vm0, %v599_v47  ;;  %1452 = vmatmul.mubr.msk.bf16.vlgmr.msra.gmra.mrb[0].mxu1 %vm626_vm0, %v609_v63 }
  0x3b   : > { %v600_v6 = vpack.c.bf16 %v1790_v3, %v1788_v0  ;;  %v601_v7 = vpack.c.bf16 %v1794_v5, %v1792_v4 }
  0x3d   : > { %1463 = vmatprep.mubr.msk.bf16.mxu0 %vm626_vm0, %v600_v6 }
  0x42   : > { %1464 = vmatmul.mubr.msk.bf16.gmra.mrb[4].mxu0 %vm626_vm0, %v601_v7 }
 0x10d   : > { %v1461_v9 = vpop.f32.mrb[0].mxu0  ;;  %v1453_v14 = vpop.f32.mrb[0].mxu1 }
 0x10e   : > { %v802_v10 = vadd.f32 %v1461_v9, %v1309_v8  ;;  %v762_v11 = vpop.f32.mrb[1].mxu0  ;;  %v689_v17 = vpop.f32.mrb[1].mxu1 }
 0x10f   : > { %v800_v15 = vadd.f32 %v1309_v8, %v762_v11  ;;  %v1462_v16 = vpop.f32.mrb[2].mxu0  ;;  %v1454_v21 = vpop.f32.mrb[2].mxu1 }
 0x110   : > { %v803_v18 = vadd.f32 %v1462_v16, %v1309_v8  ;;  %v765_v19 = vpop.f32.mrb[3].mxu0  ;;  %v814_v20 = vsel %vm626_vm0, %v802_v10, 0.0  ;;  %v692_v27 = vpop.f32.mrb[3].mxu1 }
 0x111   : > { %v801_v24 = vadd.f32 %v1309_v8, %v765_v19  ;;  %815 = vadd.xlane.f32.xlu1 %v814_v20  ;;  %v808_v25 = vsel %vm626_vm0, %v800_v15, 0.0 }
 0x112   : > { %809 = vadd.xlane.f32.xlu0 %v808_v25  ;;  %v817_v28 = vsel %vm626_vm0, %v803_v18, 0.0 }
 0x113   : > { %v811_v30 = vsel %vm626_vm0, %v801_v24, 0.0 }
 0x115   : > { %818 = vadd.xlane.f32.xlu1 %v817_v28  ;;  %v1465_v29 = vpop.f32.mrb[4].mxu0 }
 0x116   : > { %v787_v31 = vadd.f32 %v1465_v29, %v1453_v14  ;;  %812 = vadd.xlane.f32.xlu0 %v811_v30  ;;  %v778_v32 = vpop.f32.mrb[5].mxu0 }
 0x117   : > { %v779_v33 = vadd.f32 %v778_v32, %v689_v17  ;;  %v1466_v34 = vpop.f32.mrb[6].mxu0 }
 0x118   : > { %v790_v35 = vadd.f32 %v1466_v34, %v1454_v21  ;;  %v781_v26 = vpop.f32.mrb[7].mxu0  ;;  %v806_v42 = vadd.f32 %v1309_v8, %v787_v31 }
 0x119   : > { %v782_v37 = vadd.f32 %v781_v26, %v692_v27  ;;  %v804_v38 = vadd.f32 %v1309_v8, %v779_v33 }
 0x11a   : > { %v807_v44 = vadd.f32 %v1309_v8, %v790_v35  ;;  %v826_v45 = vsel %vm626_vm0, %v806_v42, 0.0 }
 0x11b   : > { %v820_v40 = vsel %vm626_vm0, %v804_v38, 0.0  ;;  %v805_v41 = vadd.f32 %v1309_v8, %v782_v37 }
 0x11c   : > { %821 = vadd.xlane.f32.xlu0 %v820_v40  ;;  %v829_v46 = vsel %vm626_vm0, %v807_v44, 0.0  ;;  %v1520_v40 = vld [vmem:[%s1944_s6 + $0x8] sm:$0xff]  }
 0x11d   : > { %v823_v43 = vsel %vm626_vm0, %v805_v41, 0.0 }
 0x11e   : > { %824 = vadd.xlane.f32.xlu1 %v823_v43 }
 0x120   : > { %827 = vadd.xlane.f32.xlu0 %v826_v45 }
 0x122   : > { %830 = vadd.xlane.f32.xlu1 %v829_v46 }
 0x19e   : > { %v816_v47 = vpop.xlane.xlu1 %815 }
 0x19f   : > { %v835_v48 = vmul.f32 0.03125, %v816_v47  ;;  %v810_v49 = vpop.xlane.xlu0 %809 }
 0x1a0   : > { %v833_v50 = vmul.f32 0.03125, %v810_v49 }
 0x1a1   : > { %v1814_v51 = vsub.f32 %v802_v10, %v835_v48 }
 0x1a2   : > { %v1816_v54 = vsub.f32 %v800_v15, %v833_v50  ;;  %v819_v55 = vpop.xlane.xlu1 %818 }
 0x1a3   : > { %v836_v56 = vmul.f32 0.03125, %v819_v55  ;;  %v813_v59 = vpop.xlane.xlu0 %812  ;;  %v851_v7 = vmul.f32 %v1814_v51, %v1814_v51 }
 0x1a4   : > { %v834_v60 = vmul.f32 0.03125, %v813_v59  ;;  %v849_v61 = vmul.f32 %v1816_v54, %v1816_v54 }
 0x1a5   : > { %v1820_v62 = vsub.f32 %v803_v18, %v836_v56  ;;  %v863_v14 = vsel %vm626_vm0, %v851_v7, 0.0 }
 0x1a6   : > { %v1822_v63 = vsub.f32 %v801_v24, %v834_v60  ;;  %v857_v6 = vsel %vm626_vm0, %v849_v61, 0.0 }
 0x1a7   : > { %858 = vadd.xlane.f32.xlu0 %v857_v6  ;;  %v852_v15 = vmul.f32 %v1820_v62, %v1820_v62 }
 0x1a8   : > { %v850_v8 = vmul.f32 %v1822_v63, %v1822_v63 }
 0x1a9   : > { %v822_v9 = vpop.xlane.xlu0 %821  ;;  %v866_v24 = vsel %vm626_vm0, %v852_v15, 0.0 }
 0x1aa   : > { %v837_v10 = vmul.f32 0.03125, %v822_v9  ;;  %v860_v11 = vsel %vm626_vm0, %v850_v8, 0.0 }
 0x1ab   : > { %861 = vadd.xlane.f32.xlu1 %v860_v11  ;;  %v825_v16 = vpop.xlane.xlu1 %824  ;;  %864 = vadd.xlane.f32.xlu0 %v863_v14 }
 0x1ac   : > { %v1833_v17 = vsub.f32 %v804_v38, %v837_v10  ;;  %v838_v18 = vmul.f32 0.03125, %v825_v16  ;;  %v1519_v38 = vld [vmem:[%s1944_s6] sm:$0xff]  }
 0x1ad   : > { %v828_v19 = vpop.xlane.xlu0 %827  ;;  %1467 = vmatprep.subr.bf16.mxu1 %v1519_v38  ;;  %v1310_v10 = vld [vmem:[%s1942_s4] ss:$0 sm:$0xff] }
 0x1ae   : > { %v1835_v20 = vsub.f32 %v805_v41, %v838_v18  ;;  %v839_v21 = vmul.f32 0.03125, %v828_v19  ;;  %v853_v25 = vmul.f32 %v1833_v17, %v1833_v17  ;;  %1468 = vmatpush3.bf16.msra.mxu1 %v1519_v38  ;;  %v1311_v18 = vld [vmem:[%s1943_s5] ss:$0 sm:$0xff] }
 0x1af   : > { %867 = vadd.xlane.f32.xlu1 %v866_v24  ;;  %v831_v27 = vpop.xlane.xlu1 %830  ;;  %1469 = vmatprep.subr.bf16.mxu1 %v1520_v40 }
 0x1b0   : > { %v1840_v28 = vsub.f32 %v806_v42, %v839_v21  ;;  %v840_v29 = vmul.f32 0.03125, %v831_v27  ;;  %v869_v30 = vsel %vm626_vm0, %v853_v25, 0.0  ;;  %v854_v31 = vmul.f32 %v1835_v20, %v1835_v20 }
 0x1b1   : > { %870 = vadd.xlane.f32.xlu0 %v869_v30 }
 0x1b2   : > { %v1845_v32 = vsub.f32 %v807_v44, %v840_v29  ;;  %v872_v33 = vsel %vm626_vm0, %v854_v31, 0.0  ;;  %v855_v34 = vmul.f32 %v1840_v28, %v1840_v28  ;;  %1470 = vmatpush3.bf16.msra.mxu1 %v1520_v40 }
 0x1b3   : > { %873 = vadd.xlane.f32.xlu1 %v872_v33 }
 0x1b4   : > { %v875_v35 = vsel %vm626_vm0, %v855_v34, 0.0  ;;  %v856_v26 = vmul.f32 %v1845_v32, %v1845_v32 }
 0x1b5   : > { %876 = vadd.xlane.f32.xlu0 %v875_v35 }
 0x1b6   : > { %v878_v37 = vsel %vm626_vm0, %v856_v26, 0.0 }
 0x1b7   : > { %879 = vadd.xlane.f32.xlu1 %v878_v37 }
 0x234   : > { %v859_v41 = vpop.xlane.xlu0 %858 }
 0x235   : > { %v881_v42 = vmul.f32 0.03125, %v859_v41 }
 0x237   : > { %v889_v43 = vadd.f32 1e-05, %v881_v42 }
 0x238   : > { %v862_v44 = vpop.xlane.xlu1 %861  ;;  %v865_v45 = vpop.xlane.xlu0 %864 }
 0x239   : > { %1521 = vrsqrt.f32 %v889_v43  ;;  %v882_v46 = vmul.f32 0.03125, %v862_v44  ;;  %v883_v47 = vmul.f32 0.03125, %v865_v45 }
 0x23b   : > { %v890_v48 = vadd.f32 1e-05, %v882_v46  ;;  %v891_v49 = vadd.f32 1e-05, %v883_v47 }
 0x23c   : > { %v868_v50 = vpop.xlane.xlu1 %867 }
 0x23d   : > { %1523 = vrsqrt.f32 %v890_v48  ;;  %v884_v55 = vmul.f32 0.03125, %v868_v50 }
 0x23e   : > { %1525 = vrsqrt.f32 %v891_v49  ;;  %v871_v56 = vpop.xlane.xlu0 %870 }
 0x23f   : > { %v892_v59 = vadd.f32 1e-05, %v884_v55  ;;  %v885_v60 = vmul.f32 0.03125, %v871_v56 }
 0x240   : > { %v874_v61 = vpop.xlane.xlu1 %873 }
 0x241   : > { %1527 = vrsqrt.f32 %v892_v59  ;;  %v893_v6 = vadd.f32 1e-05, %v885_v60  ;;  %v886_v7 = vmul.f32 0.03125, %v874_v61 }
 0x242   : > { %v877_v8 = vpop.xlane.xlu0 %876 }
 0x243   : > { %v1522_v9 = vpop.eup %1521  ;;  %1529 = vrsqrt.f32 %v893_v6  ;;  %v894_v11 = vadd.f32 1e-05, %v886_v7  ;;  %v887_v14 = vmul.f32 0.03125, %v877_v8 }
 0x244   : > { %v905_v15 = vmul.f32 %v1522_v9, %v1816_v54  ;;  %v880_v16 = vpop.xlane.xlu1 %879 }
 0x245   : > { %1531 = vrsqrt.f32 %v894_v11  ;;  %v895_v19 = vadd.f32 1e-05, %v887_v14  ;;  %v888_v21 = vmul.f32 0.03125, %v880_v16 }
 0x246   : > { %v920_v24 = vmul.f32 %v1310_v10, %v905_v15 }
 0x247   : > { %v1524_v25 = vpop.eup %1523  ;;  %1533 = vrsqrt.f32 %v895_v19  ;;  %v896_v27 = vadd.f32 1e-05, %v888_v21 }
 0x248   : > { %v1526_v29 = vpop.eup %1525  ;;  %v906_v30 = vmul.f32 %v1524_v25, %v1822_v63  ;;  %v935_v31 = vadd.f32 %v1311_v18, %v920_v24 }
 0x249   : > { %v907_v33 = vmul.f32 %v1526_v29, %v1814_v51  ;;  %1535 = vrsqrt.f32 %v896_v27 }
 0x24a   : > { %v921_v54 = vmul.f32 %v1310_v10, %v906_v30  ;;  %v951_v34 = vmul.f32 0.70710677, %v935_v31  ;;  %v943_v19 = vmul.f32 0.5, %v935_v31 }
 0x24b   : > { %v1528_v35 = vpop.eup %1527  ;;  %v922_v26 = vmul.f32 %v1310_v10, %v907_v33 }
 0x24c   : > { %v908_v37 = vmul.f32 %v1528_v35, %v1820_v62  ;;  %v936_v38 = vadd.f32 %v1311_v18, %v921_v54  ;;  %1537 = verf.f32 %v951_v34 }
 0x24d   : > { %v1530_v40 = vpop.eup %1529  ;;  %v937_v41 = vadd.f32 %v1311_v18, %v922_v26 }
 0x24e   : > { %v923_v42 = vmul.f32 %v1310_v10, %v908_v37  ;;  %v909_v43 = vmul.f32 %v1530_v40, %v1833_v17  ;;  %v952_v44 = vmul.f32 0.70710677, %v936_v38  ;;  %v944_v21 = vmul.f32 0.5, %v936_v38 }
 0x24f   : > { %v1532_v45 = vpop.eup %1531  ;;  %v953_v63 = vmul.f32 0.70710677, %v937_v41  ;;  %v945_v30 = vmul.f32 0.5, %v937_v41 }
 0x250   : > { %v938_v46 = vadd.f32 %v1311_v18, %v923_v42  ;;  %v924_v47 = vmul.f32 %v1310_v10, %v909_v43  ;;  %v910_v51 = vmul.f32 %v1532_v45, %v1835_v20  ;;  %1539 = verf.f32 %v952_v44 }
 0x251   : > { %v1534_v48 = vpop.eup %1533  ;;  %1541 = verf.f32 %v953_v63 }
 0x252   : > { %v954_v49 = vmul.f32 0.70710677, %v938_v46  ;;  %v925_v50 = vmul.f32 %v1310_v10, %v910_v51  ;;  %v911_v62 = vmul.f32 %v1534_v48, %v1840_v28  ;;  %v939_v56 = vadd.f32 %v1311_v18, %v924_v47 }
 0x253   : > { %v1536_v55 = vpop.eup %1535  ;;  %v946_v33 = vmul.f32 0.5, %v938_v46 }
 0x254   : > { %v926_v59 = vmul.f32 %v1310_v10, %v911_v62  ;;  %v912_v60 = vmul.f32 %v1536_v55, %v1845_v32  ;;  %1543 = verf.f32 %v954_v49  ;;  %v940_v17 = vadd.f32 %v1311_v18, %v925_v50  ;;  %v1312_v55 = vld [vmem:[%s1945_s7] ss:$0 sm:$0xff] }
 0x255   : > { %v955_v61 = vmul.f32 0.70710677, %v939_v56  ;;  %v947_v31 = vmul.f32 0.5, %v939_v56 }
 0x256   : > { %v1538_v6 = vpop.eup %1537  ;;  %v927_v7 = vmul.f32 %v1310_v10, %v912_v60  ;;  %v956_v8 = vmul.f32 0.70710677, %v940_v17  ;;  %v941_v9 = vadd.f32 %v1311_v18, %v926_v59  ;;  %v948_v38 = vmul.f32 0.5, %v940_v17 }
 0x257   : > { %1545 = verf.f32 %v955_v61  ;;  %v967_v14 = vadd.f32 1.0, %v1538_v6 }
 0x258   : > { %1547 = verf.f32 %v956_v8  ;;  %v942_v20 = vadd.f32 %v1311_v18, %v927_v7  ;;  %v957_v11 = vmul.f32 0.70710677, %v941_v9  ;;  %v949_v47 = vmul.f32 0.5, %v941_v9 }
 0x259   : > { %v975_v32 = vmul.f32 %v967_v14, %v943_v19 }
 0x25a   : > { %v1540_v15 = vpop.eup %1539  ;;  %v958_v16 = vmul.f32 0.70710677, %v942_v20  ;;  %1549 = verf.f32 %v957_v11  ;;  %v950_v51 = vmul.f32 0.5, %v942_v20 }
 0x25b   : > { %v1542_v28 = vpop.eup %1541  ;;  %v968_v24 = vadd.f32 1.0, %v1540_v15 }
 0x25c   : > { %1551 = verf.f32 %v958_v16  ;;  %v969_v27 = vadd.f32 1.0, %v1542_v28 }
 0x25d   : > { %v976_v25 = vmul.f32 %v968_v24, %v944_v21 }
 0x25e   : > { %v1544_v29 = vpop.eup %1543  ;;  %v977_v18 = vmul.f32 %v969_v27, %v945_v30 }
 0x25f   : > { %v983_v10 = vpack.c.bf16 %v976_v25, %v975_v32  ;;  %v970_v54 = vadd.f32 1.0, %v1544_v29 }
 0x261   : > { %v1546_v34 = vpop.eup %1545  ;;  %1471 = vmatprep.mubr.msk.bf16.mxu1 %vm626_vm0, %v983_v10  ;;  %v978_v35 = vmul.f32 %v970_v54, %v946_v33 }
 0x262   : > { %v1548_v26 = vpop.eup %1547  ;;  %v971_v37 = vadd.f32 1.0, %v1546_v34 }
 0x263   : > { %v984_v40 = vpack.c.bf16 %v978_v35, %v977_v18  ;;  %v972_v42 = vadd.f32 1.0, %v1548_v26 }
 0x264   : > { %v1550_v43 = vpop.eup %1549  ;;  %v979_v44 = vmul.f32 %v971_v37, %v947_v31 }
 0x265   : > { %1472 = vmatmul.mubr.msk.bf16.vlgmr.msra.gmra.mrb[4].mxu1 %vm626_vm0, %v984_v40  ;;  %v980_v45 = vmul.f32 %v972_v42, %v948_v38  ;;  %v973_v63 = vadd.f32 1.0, %v1550_v43 }
 0x266   : > { %v1552_v41 = vpop.eup %1551 }
 0x267   : > { %v985_v46 = vpack.c.bf16 %v980_v45, %v979_v44  ;;  %v974_v48 = vadd.f32 1.0, %v1552_v41  ;;  %v981_v49 = vmul.f32 %v973_v63, %v949_v47  ;;  %v1137_v44 = vsub.f32 %v1765_v22, %v1742_v1 }
 0x268   : > { %v1135_v41 = vsub.f32 %v1754_v12, %v1734_v52  ;;  %v1138_v47 = vsub.f32 %v1767_v23, %v1744_v2 }
 0x269   : > { %1475 = vmatprep.mubr.msk.bf16.mxu1 %vm626_vm0, %v985_v46  ;;  %v982_v50 = vmul.f32 %v974_v48, %v950_v51 }
 0x26b   : > { %v986_v62 = vpack.c.bf16 %v982_v50, %v981_v49  ;;  %v1136_v49 = vsub.f32 %v1756_v13, %v1736_v53 }
 0x26d   : > { %1476 = vmatmul.mubr.msk.bf16.gmra.mrb[8].mxu1 %vm626_vm0, %v986_v62 }
 0x338   : > { %v1473_v56 = vpop.f32.mrb[4].mxu1 }
 0x339   : > { %v1065_v59 = vadd.f32 %v1473_v56, %v1312_v55  ;;  %v1056_v60 = vpop.f32.mrb[5].mxu1 }
 0x33a   : > { %v1057_v17 = vadd.f32 %v1312_v55, %v1056_v60  ;;  %v1474_v61 = vpop.f32.mrb[6].mxu1  ;;  %v1141_v60 = vsub.f32 %v1792_v4, %v1781_v57  ;;  %v1140_v4 = vsub.f32 %v1790_v3, %v1774_v39 }
 0x33b   : > { %v1321_v6 = vmul.f32 -1.442695, %v1065_v59  ;;  %v1068_v7 = vadd.f32 %v1474_v61, %v1312_v55  ;;  %v1059_v8 = vpop.f32.mrb[7].mxu1  ;;  %v1139_v61 = vsub.f32 %v1788_v0, %v1772_v36 }
 0x33c   : > { %v1319_v9 = vmul.f32 -1.442695, %v1057_v17  ;;  %v1060_v20 = vadd.f32 %v1312_v55, %v1059_v8  ;;  %v1142_v8 = vsub.f32 %v1794_v5, %v1783_v58 }
 0x33d   : > { %1553 = vpow2.f32 %v1321_v6  ;;  %v1322_v11 = vmul.f32 -1.442695, %v1068_v7 }
 0x33e   : > { %1555 = vpow2.f32 %v1319_v9  ;;  %v1320_v14 = vmul.f32 -1.442695, %v1060_v20 }
 0x33f   : > { %1557 = vpow2.f32 %v1322_v11 }
 0x340   : > { %1559 = vpow2.f32 %v1320_v14  ;;  %v1477_v15 = vpop.f32.mrb[8].mxu1 }
 0x341   : > { %v1081_v16 = vadd.f32 %v1477_v15, %v1312_v55  ;;  %v1072_v28 = vpop.f32.mrb[9].mxu1 }
 0x342   : > { %v1073_v19 = vadd.f32 %v1312_v55, %v1072_v28  ;;  %v1478_v21 = vpop.f32.mrb[10].mxu1 }
 0x343   : > { %v1325_v24 = vmul.f32 -1.442695, %v1081_v16  ;;  %v1084_v32 = vadd.f32 %v1478_v21, %v1312_v55  ;;  %v1075_v25 = vpop.f32.mrb[11].mxu1 }
 0x344   : > { %v1323_v27 = vmul.f32 -1.442695, %v1073_v19  ;;  %v1076_v29 = vadd.f32 %v1312_v55, %v1075_v25 }
 0x345   : > { %1561 = vpow2.f32 %v1325_v24  ;;  %v1326_v10 = vmul.f32 -1.442695, %v1084_v32 }
 0x346   : > { %1563 = vpow2.f32 %v1323_v27  ;;  %v1324_v30 = vmul.f32 -1.442695, %v1076_v29 }
 0x347   : > { %v1554_v33 = vpop.eup %1553  ;;  %1565 = vpow2.f32 %v1326_v10 }
 0x348   : > { %v1556_v54 = vpop.eup %1555  ;;  %v1113_v34 = vadd.f32 1.0, %v1554_v33  ;;  %1567 = vpow2.f32 %v1324_v30 }
 0x349   : > { %v1558_v18 = vpop.eup %1557  ;;  %v1111_v35 = vadd.f32 1.0, %v1556_v54 }
 0x34a   : > { %v1560_v26 = vpop.eup %1559  ;;  %1569 = vrcp.f32 %v1113_v34  ;;  %v1114_v37 = vadd.f32 1.0, %v1558_v18 }
 0x34b   : > { %1571 = vrcp.f32 %v1111_v35  ;;  %v1112_v40 = vadd.f32 1.0, %v1560_v26 }
 0x34c   : > { %1573 = vrcp.f32 %v1114_v37 }
 0x34d   : > { %1575 = vrcp.f32 %v1112_v40 }
 0x34f   : > { %v1562_v31 = vpop.eup %1561 }
 0x350   : > { %v1564_v38 = vpop.eup %1563  ;;  %v1117_v42 = vadd.f32 1.0, %v1562_v31 }
 0x351   : > { %v1566_v43 = vpop.eup %1565  ;;  %v1115_v45 = vadd.f32 1.0, %v1564_v38 }
 0x352   : > { %v1568_v63 = vpop.eup %1567  ;;  %1577 = vrcp.f32 %v1117_v42  ;;  %v1118_v46 = vadd.f32 1.0, %v1566_v43 }
 0x353   : > { %1579 = vrcp.f32 %v1115_v45  ;;  %v1116_v51 = vadd.f32 1.0, %v1568_v63 }
 0x354   : > { %v1570_v48 = vpop.eup %1569  ;;  %1581 = vrcp.f32 %v1118_v46 }
 0x355   : > { %v1572_v50 = vpop.eup %1571  ;;  %v1145_v22 = vmul.f32 %v1570_v48, %v1137_v44  ;;  %1583 = vrcp.f32 %v1116_v51 }
 0x356   : > { %v1574_v62 = vpop.eup %1573  ;;  %v1143_v55 = vmul.f32 %v1572_v50, %v1135_v41 }
 0x357   : > { %v1576_v56 = vpop.eup %1575  ;;  %v1153_v12 = vadd.f32 %v1145_v22, %v1742_v1  ;;  %v1146_v59 = vmul.f32 %v1574_v62, %v1138_v47 }
 0x358   : > { %v1151_v13 = vadd.f32 %v1143_v55, %v1734_v52  ;;  %v1144_v23 = vmul.f32 %v1576_v56, %v1136_v49 }
 0x359   : > { %v1340_v17 = vpack.c.bf16 %v1153_v12, %v1153_v12  ;;  %v1154_v1 = vadd.f32 %v1146_v59, %v1744_v2 }
 0x35a   : > { %v1338_v6 = vpack.c.bf16 %v1151_v13, %v1151_v13  ;;  %v1152_v7 = vadd.f32 %v1144_v23, %v1736_v53 }
 0x35b   : > { %1194 = vst.msk [vmem:[%s1895_s10 + $0x8] sm:$0xf] %vm1191_vm1, %v1340_v17  ;;  %v1341_v52 = vpack.c.bf16 %v1154_v1, %v1154_v1 }
 0x35c   : > { %v1578_v9 = vpop.eup %1577  ;;  %1192 = vst.msk [vmem:[%s1895_s10] sm:$0xf] %vm1191_vm1, %v1338_v6  ;;  %v1339_v20 = vpack.c.bf16 %v1152_v7, %v1152_v7 }
 0x35d   : > { %v1580_v2 = vpop.eup %1579  ;;  %1195 = vst.msk [vmem:[%s1895_s10 + $0xc] sm:$0xf] %vm1191_vm1, %v1341_v52  ;;  %v1149_v0 = vmul.f32 %v1578_v9, %v1141_v60 }
 0x35e   : > { %v1582_v53 = vpop.eup %1581  ;;  %1193 = vst.msk [vmem:[%s1895_s10 + $0x4] sm:$0xf] %vm1191_vm1, %v1339_v20  ;;  %v1147_v5 = vmul.f32 %v1580_v2, %v1139_v61 }
 0x35f   : > { %v1584_v11 = vpop.eup %1583  ;;  %v1157_v14 = vadd.f32 %v1149_v0, %v1781_v57  ;;  %v1150_v15 = vmul.f32 %v1582_v53, %v1142_v8 }
 0x360   : > { %v1155_v3 = vadd.f32 %v1147_v5, %v1772_v36  ;;  %v1148_v16 = vmul.f32 %v1584_v11, %v1140_v4 }
 0x361   : > { %v1344_v28 = vpack.c.bf16 %v1157_v14, %v1157_v14  ;;  %v1158_v19 = vadd.f32 %v1150_v15, %v1783_v58 }
 0x362   : > { %v1342_v21 = vpack.c.bf16 %v1155_v3, %v1155_v3  ;;  %v1156_v24 = vadd.f32 %v1148_v16, %v1774_v39 }
 0x363   : > { %1198 = vst.msk [vmem:[%s1895_s10 + $0x18] sm:$0xf] %vm1191_vm1, %v1344_v28  ;;  %v1345_v32 = vpack.c.bf16 %v1158_v19, %v1158_v19 }
 0x364   : > { %1196 = vst.msk [vmem:[%s1895_s10 + $0x10] sm:$0xf] %vm1191_vm1, %v1342_v21  ;;  %v1343_v25 = vpack.c.bf16 %v1156_v24, %v1156_v24 }
 0x365   : > { %1199 = vst.msk [vmem:[%s1895_s10 + $0x1c] sm:$0xf] %vm1191_vm1, %v1345_v32 }
 0x366   : > { %1197 = vst.msk [vmem:[%s1895_s10 + $0x14] sm:$0xf] %vm1191_vm1, %v1343_v25 }
 0x367 PF: > { %p15_p9 = scmp.ge.s32.totalorder %s1671_s9, 6   ;;  %s1947_s27 = smov %s1603_s28 }
 0x368   : > { %s1948_s28 = smov %s1680_s12  ;;  %s1949_s29 = smov %s1671_s9 }
 0x369   :  { %17 = sbr.rel (!%p15_p9) target bundleno = 2 (0x2), region = 131 }

</bundles_post_ra>
